<compile_context>
chip_gen: v7x
topology: tpu7x:2x2x1
jax: 0.10.0
libtpu: 0.0.40
codegen_flags: <defaults>
</compile_context>

<pallas_src>
import numpy as np
import jax
import jax.numpy as jnp
from jax.experimental import pallas as pl
from jax.experimental.pallas import tpu as pltpu

OBS_DIM = 16      # observation dimension
HIDDEN = 32       # agent hidden width
N_ACTIONS = 8     # size of the action distribution
LANES = 128       # TPU lane width
MAX_TILE = 512    # rows per grid step (review: big tiles amortize per-step cost)

# --- packed parameter slab layout (rows) ----------------------------------
ROW_W1 = 0                     # rows [0, 16):   W1 padded to 128 lanes
ROW_B1 = OBS_DIM               # row 16:         b1 (rows 16..23 reserved)
ROW_WH = 24                    # rows [24, 152): fused head weight (128x128)
ROW_BH = ROW_WH + LANES        # row 152:        fused head bias (rows 152..159 reserved)
P_ROWS = ROW_BH + 8            # 160 rows total

# --- packed output lane layout ---------------------------------------------
LANE_ACTION = N_ACTIONS        # lane 8:  sampled action (as f32)
LANE_LOGP = N_ACTIONS + 1      # lane 9:  log_prob(action)
LANE_VALUE = N_ACTIONS + 2     # lane 10: critic value (head column 10 directly)
# lanes 0..7 hold the softmax probabilities


def policy_kernel(x_ref, en_ref, p_ref, out_ref):
    """Batched agent MLP + softmax + exponential-race categorical sample + log_prob."""
    tm = x_ref.shape[0]
    x = x_ref[...]                                                   # (tm, OBS_DIM)

    # ---- agent MLP (weights sliced from the VMEM-resident slab) ----
    w1 = p_ref[ROW_W1:ROW_W1 + OBS_DIM, :]                           # (16, 128)
    b1 = p_ref[ROW_B1:ROW_B1 + 1, :]                                 # (1, 128)
    wh = p_ref[ROW_WH:ROW_WH + LANES, :]                             # (128, 128)
    bh = p_ref[ROW_BH:ROW_BH + 1, :]                                 # (1, 128)

    h = jnp.maximum(
        jnp.dot(x, w1, preferred_element_type=jnp.float32) + b1, 0.0)  # (tm, 128)
    head = jnp.dot(h, wh, preferred_element_type=jnp.float32) + bh     # (tm, 128)
    # head lanes 0..7 = action scores, lane LANE_VALUE (=10) = critic value

    lane = jax.lax.broadcasted_iota(jnp.int32, (tm, LANES), 1)
    neg_big = jnp.float32(-1e30)                                     # finite "-inf"
    scores = jnp.where(lane < N_ACTIONS, head, neg_big)              # (tm, 128)

    # ---- numerically-stable softmax over the action lanes ----
    m = jnp.max(scores, axis=-1, keepdims=True)                      # (tm, 1)
    e = jnp.exp(scores - m)                                          # padded lanes -> 0
    denom = jnp.sum(e, axis=-1, keepdims=True)                       # (tm, 1)
    log_denom = jnp.log(denom)                                       # (tm, 1)
    probs = e / denom                                                # exact normalization

    # ---- exponential-race categorical sample (8-lane sub-space) ----
    # argmax_i e_i / En_i with En ~ Exp(1) is an exact Categorical(probs) sample.
    e8 = e[:, :N_ACTIONS]                                            # (tm, 8)
    en8 = en_ref[...]                                                # (tm, 8) positive
    keys8 = e8 / en8                                                 # (tm, 8)
    kmax = jnp.max(keys8, axis=-1, keepdims=True)                    # (tm, 1)
    lane8 = jax.lax.broadcasted_iota(jnp.int32, (tm, N_ACTIONS), 1)
    winner = jnp.where(keys8 >= kmax, lane8, N_ACTIONS).astype(jnp.float32)
    action = jnp.min(winner, axis=-1, keepdims=True).astype(jnp.int32)  # (tm, 1)
    action = jnp.minimum(action, N_ACTIONS - 1)                      # clamp (safety)

    # ---- log_prob(action): gather the raw score, subtract per-row scalars ----
    # (no full (tm,128) log-softmax tensor is materialized)
    head8 = head[:, :N_ACTIONS]                                      # (tm, 8)
    onehot8 = (lane8 == action).astype(jnp.float32)                  # (tm, 8)
    s_a = jnp.sum(onehot8 * head8, axis=-1, keepdims=True)           # (tm, 1)
    logp = s_a - m - log_denom                                       # (tm, 1)

    # ---- one lane-dense packed store ----
    packed = probs                                                   # lanes >= 8 are 0
    packed = jnp.where(lane == LANE_ACTION, action.astype(jnp.float32), packed)
    packed = jnp.where(lane == LANE_LOGP, logp, packed)
    packed = jnp.where(lane == LANE_VALUE, head, packed)             # critic already at lane 10
    out_ref[...] = packed


# ---------------------------------------------------------------------------
# host-side glue
# ---------------------------------------------------------------------------
def init_agent_params(key):
    """Deterministic synthetic agent parameters (obs -> hidden -> {A, 1})."""
    k1, k2, k3 = jax.random.split(key, 3)
    w1 = 0.1 * jax.random.normal(k1, (OBS_DIM, HIDDEN), jnp.float32)
    b1 = jnp.zeros((1, HIDDEN), jnp.float32)
    w2 = 0.1 * jax.random.normal(k2, (HIDDEN, N_ACTIONS), jnp.float32)
    b2 = jnp.zeros((1, N_ACTIONS), jnp.float32)
    w3 = 0.1 * jax.random.normal(k3, (HIDDEN, 1), jnp.float32)
    b3 = jnp.zeros((1, 1), jnp.float32)
    return (w1, b1, w2, b2, w3, b3)


def pack_params(w1, b1, w2, b2, w3, b3):
    """Pack the 6 agent tensors into one (P_ROWS, 128) f32 slab (one DMA).

    The critic column is placed at head output lane LANE_VALUE so the kernel
    never has to move it.
    """
    slab = jnp.zeros((P_ROWS, LANES), jnp.float32)
    slab = slab.at[ROW_W1:ROW_W1 + OBS_DIM, 0:HIDDEN].set(w1)
    slab = slab.at[ROW_B1, 0:HIDDEN].set(b1.reshape(HIDDEN))
    slab = slab.at[ROW_WH:ROW_WH + HIDDEN, 0:N_ACTIONS].set(w2)                # actor head
    slab = slab.at[ROW_WH:ROW_WH + HIDDEN, LANE_VALUE].set(w3.reshape(HIDDEN)) # critic head
    slab = slab.at[ROW_BH, 0:N_ACTIONS].set(b2.reshape(N_ACTIONS))
    slab = slab.at[ROW_BH, LANE_VALUE].set(b3.reshape(()))
    return slab


def _round_up(x, m):
    return ((x + m - 1) // m) * m


def _choose_tile(b8):
    """Rows per grid step: as large as possible, but keep >= 2 grid steps when
    the batch allows it (so v7x can use both TensorCores)."""
    if b8 <= 8:
        return b8
    half = _round_up((b8 + 1) // 2, 8)
    return min(MAX_TILE, half)


@jax.jit
def policy_forward(observations, param_slab, seed):
    """Batched Policy.forward: softmax(agent(obs)), sample, log_prob, value.

    observations: (B, OBS_DIM) f32.  Returns (actions i32 (B,), logp (B,),
    probs (B, N_ACTIONS), value (B,)), all on device.
    """
    obs = observations.astype(jnp.float32)
    b = obs.shape[0]
    b8 = _round_up(b, 8)
    tm = _choose_tile(b8)
    b_pad = _round_up(b8, tm)
    if b_pad != b:
        obs = jnp.pad(obs, ((0, b_pad - b), (0, 0)))

    # i.i.d. Exp(1) noise for the exponential-race sampler.  Generated here
    # (jax.random) because pltpu.prng_* does not lower in interpret mode; the
    # stream only depends on (seed, row index), not on the tile size.
    key = jax.random.PRNGKey(seed)
    noise = jax.random.exponential(key, (b_pad, N_ACTIONS), jnp.float32)
    noise = jnp.maximum(noise, jnp.float32(1e-30))     # strictly positive

    out = pl.pallas_call(
        policy_kernel,
        out_shape=jax.ShapeDtypeStruct((b_pad, LANES), jnp.float32),
        grid=(b_pad // tm,),
        in_specs=[
            pl.BlockSpec((tm, OBS_DIM), lambda i: (i, 0)),      # obs tiles
            pl.BlockSpec((tm, N_ACTIONS), lambda i: (i, 0)),    # Exp(1) noise tiles
            pl.BlockSpec((P_ROWS, LANES), lambda i: (0, 0)),    # weights: VMEM-resident
        ],
        out_specs=pl.BlockSpec((tm, LANES), lambda i: (i, 0)),
        compiler_params=pltpu.CompilerParams(
            dimension_semantics=("parallel",)),   # shard batch axis across TCs (v7x)
    )(obs, noise, param_slab)

    out = out[:b]
    probs = out[:, :N_ACTIONS]
    actions = out[:, LANE_ACTION].astype(jnp.int32)
    logp = out[:, LANE_LOGP]
    value = out[:, LANE_VALUE]
    return actions, logp, probs, value


class Policy:
    """Thin Python wrapper matching the torch module's bookkeeping."""

    def __init__(self, params, seed=0):
        self.param_slab = pack_params(*params)
        self.saved_log_probs = []
        self.rewards = []
        self._seed = int(seed)

    def forward(self, observations):
        """Sample action(s) from the agent's output distribution.

        Accepts a single (OBS_DIM,) observation (like the torch module's
        unsqueeze(0)) or a (B, OBS_DIM) batch.  Actions stay on device;
        convert with int() once per rollout rather than per step.
        """
        obs = jnp.asarray(observations, jnp.float32)
        if obs.ndim == 1:
            obs = obs[None, :]
        actions, logp, _probs, _value = policy_forward(obs, self.param_slab, self._seed)
        self._seed += 1
        self.saved_log_probs.append(logp)     # dist.log_prob(action)
        return actions


def reference_forward(obs, params):
    """Pure-JAX reference of the deterministic part (probs, log_softmax, value)."""
    w1, b1, w2, b2, w3, b3 = params
    h = jnp.maximum(obs @ w1 + b1, 0.0)
    scores = h @ w2 + b2
    value = (h @ w3 + b3)[:, 0]
    probs = jax.nn.softmax(scores, axis=-1)
    logsm = jax.nn.log_softmax(scores, axis=-1)
    return probs, logsm, value


if __name__ == "__main__":
    root = jax.random.PRNGKey(0)
    k_params, k_obs = jax.random.split(root, 2)

    params = init_agent_params(k_params)
    policy = Policy(params, seed=0)

    B = 64
    observations = jax.random.normal(k_obs, (B, OBS_DIM), jnp.float32)

    actions, logp, probs, value = policy_forward(observations, policy.param_slab, 0)
    jax.block_until_ready((actions, logp, probs, value))

    actions_np = np.asarray(jax.device_get(actions))
    logp_np = np.asarray(jax.device_get(logp))
    probs_np = np.asarray(jax.device_get(probs))
    value_np = np.asarray(jax.device_get(value))

    # sanity: actions in range, probs sum to ~1
    assert actions_np.min() >= 0 and actions_np.max() < N_ACTIONS
    assert np.allclose(probs_np.sum(-1), 1.0, atol=1e-3)

    # deterministic parts match a pure-JAX reference
    ref_probs, ref_logsm, ref_value = reference_forward(observations, params)
    assert np.allclose(probs_np, np.asarray(ref_probs), atol=1e-2)
    assert np.allclose(value_np, np.asarray(ref_value), atol=1e-2)
    ref_logp = np.asarray(ref_logsm)[np.arange(B), actions_np]
    assert np.allclose(logp_np, ref_logp, atol=1e-2)

    # single-observation path (original torch forward semantics)
    a = policy.forward(observations[0])
    jax.block_until_ready(a)
    assert 0 <= int(a[0]) < N_ACTIONS
    assert len(policy.saved_log_probs) == 1

    print("KERNEL_OK")
</pallas_src>

<mosaic_0001>
module attributes {stable_mosaic.version = 11 : i64} {
  func.func @policy_kernel(%arg0: i32, %arg1: memref<32x16xf32, #tpu.memory_space<vmem>>, %arg2: memref<32x8xf32, #tpu.memory_space<vmem>>, %arg3: memref<160x128xf32, #tpu.memory_space<vmem>>, %arg4: memref<32x128xf32, #tpu.memory_space<vmem>>) attributes {dimension_semantics = [#tpu.dimension_semantics<parallel>], iteration_bounds = array<i64: 2>, scalar_prefetch = 0 : i64, scratch_operands = 0 : i64, tpu.core_type = #tpu.core_type<tc>, window_params = [{transform_indices = @transform_0, window_bounds = array<i64: 32, 16>}, {transform_indices = @transform_1, window_bounds = array<i64: 32, 8>}, {pipeline_mode = #tpu.pipeline_mode<synchronous>, transform_indices = @transform_2, window_bounds = array<i64: 160, 128>}, {transform_indices = @transform_3, window_bounds = array<i64: 32, 128>}]} {
    %c0 = arith.constant 0 : index
    %c0_0 = arith.constant 0 : index
    %0 = vector.load %arg1[%c0, %c0_0] : memref<32x16xf32, #tpu.memory_space<vmem>>, vector<32x16xf32>
    %c0_1 = arith.constant 0 : index
    %c0_2 = arith.constant 0 : index
    %1 = vector.load %arg3[%c0_1, %c0_2] : memref<160x128xf32, #tpu.memory_space<vmem>>, vector<16x128xf32>
    %c16 = arith.constant 16 : index
    %c0_3 = arith.constant 0 : index
    %2 = vector.load %arg3[%c16, %c0_3] : memref<160x128xf32, #tpu.memory_space<vmem>>, vector<1x128xf32>
    %c24 = arith.constant 24 : index
    %c0_4 = arith.constant 0 : index
    %3 = vector.load %arg3[%c24, %c0_4] : memref<160x128xf32, #tpu.memory_space<vmem>>, vector<128x128xf32>
    %c152 = arith.constant 152 : index
    %c0_5 = arith.constant 0 : index
    %4 = vector.load %arg3[%c152, %c0_5] : memref<160x128xf32, #tpu.memory_space<vmem>>, vector<1x128xf32>
    %cst = arith.constant dense<0.000000e+00> : vector<32x128xf32>
    %5 = tpu.matmul %0, %1, %cst {dimension_numbers = #tpu.dot_dimension_numbers<[1], [0], [0], [1], [0, 0, 1, 1], [], []>} : vector<32x16xf32>, vector<16x128xf32>, vector<32x128xf32> -> vector<32x128xf32>
    %6 = vector.broadcast %2 : vector<1x128xf32> to vector<32x128xf32>
    %7 = arith.addf %5, %6 : vector<32x128xf32>
    %cst_6 = arith.constant 0.000000e+00 : f32
    %8 = vector.broadcast %cst_6 : f32 to vector<32x128xf32>
    %9 = arith.maximumf %7, %8 : vector<32x128xf32>
    %cst_7 = arith.constant dense<0.000000e+00> : vector<32x128xf32>
    %10 = tpu.matmul %9, %3, %cst_7 {dimension_numbers = #tpu.dot_dimension_numbers<[1], [0], [0], [1], [0, 0, 1, 1], [], []>} : vector<32x128xf32>, vector<128x128xf32>, vector<32x128xf32> -> vector<32x128xf32>
    %11 = vector.broadcast %4 : vector<1x128xf32> to vector<32x128xf32>
    %12 = arith.addf %10, %11 : vector<32x128xf32>
    %13 = tpu.iota {dimensions = array<i32: 1>} : vector<32x128xi32>
    %c8_i32 = arith.constant 8 : i32
    %14 = vector.broadcast %c8_i32 : i32 to vector<32x128xi32>
    %15 = arith.cmpi slt, %13, %14 : vector<32x128xi32>
    %cst_8 = arith.constant -1.000000e+30 : f32
    %16 = vector.broadcast %cst_8 : f32 to vector<32x128xf32>
    %17 = arith.select %15, %12, %16 : vector<32x128xi1>, vector<32x128xf32>
    %cst_9 = arith.constant dense<0xFF800000> : vector<32xf32>
    %18 = vector.multi_reduction <maximumf>, %17, %cst_9 [1] : vector<32x128xf32> to vector<32xf32>
    %19 = vector.shape_cast %18 : vector<32xf32> to vector<32x1xf32>
    %20 = vector.broadcast %19 : vector<32x1xf32> to vector<32x128xf32>
    %21 = arith.subf %17, %20 : vector<32x128xf32>
    %22 = math.exp %21 : vector<32x128xf32>
    %cst_10 = arith.constant dense<0.000000e+00> : vector<32xf32>
    %23 = vector.multi_reduction <add>, %22, %cst_10 [1] : vector<32x128xf32> to vector<32xf32>
    %24 = vector.shape_cast %23 : vector<32xf32> to vector<32x1xf32>
    %25 = math.log %24 : vector<32x1xf32>
    %26 = vector.broadcast %24 : vector<32x1xf32> to vector<32x128xf32>
    %27 = arith.divf %22, %26 : vector<32x128xf32>
    %28 = vector.extract_strided_slice %22 {offsets = [0, 0], sizes = [32, 8], strides = [1, 1]} : vector<32x128xf32> to vector<32x8xf32>
    %c0_11 = arith.constant 0 : index
    %c0_12 = arith.constant 0 : index
    %29 = vector.load %arg2[%c0_11, %c0_12] : memref<32x8xf32, #tpu.memory_space<vmem>>, vector<32x8xf32>
    %30 = arith.divf %28, %29 : vector<32x8xf32>
    %cst_13 = arith.constant dense<0xFF800000> : vector<32xf32>
    %31 = vector.multi_reduction <maximumf>, %30, %cst_13 [1] : vector<32x8xf32> to vector<32xf32>
    %32 = vector.shape_cast %31 : vector<32xf32> to vector<32x1xf32>
    %33 = tpu.iota {dimensions = array<i32: 1>} : vector<32x8xi32>
    %34 = vector.broadcast %32 : vector<32x1xf32> to vector<32x8xf32>
    %35 = arith.cmpf oge, %30, %34 : vector<32x8xf32>
    %c8_i32_14 = arith.constant 8 : i32
    %36 = vector.broadcast %c8_i32_14 : i32 to vector<32x8xi32>
    %37 = arith.select %35, %33, %36 : vector<32x8xi1>, vector<32x8xi32>
    %38 = arith.sitofp %37 : vector<32x8xi32> to vector<32x8xf32>
    %cst_15 = arith.constant dense<0x7F800000> : vector<32xf32>
    %39 = vector.multi_reduction <minimumf>, %38, %cst_15 [1] : vector<32x8xf32> to vector<32xf32>
    %40 = vector.shape_cast %39 : vector<32xf32> to vector<32x1xf32>
    %41 = arith.fptosi %40 : vector<32x1xf32> to vector<32x1xi32>
    %c7_i32 = arith.constant 7 : i32
    %42 = vector.broadcast %c7_i32 : i32 to vector<32x1xi32>
    %43 = arith.minsi %41, %42 : vector<32x1xi32>
    %44 = vector.extract_strided_slice %12 {offsets = [0, 0], sizes = [32, 8], strides = [1, 1]} : vector<32x128xf32> to vector<32x8xf32>
    %45 = vector.broadcast %43 : vector<32x1xi32> to vector<32x8xi32>
    %46 = arith.cmpi eq, %33, %45 : vector<32x8xi32>
    %47 = arith.extui %46 : vector<32x8xi1> to vector<32x8xi32>
    %48 = arith.sitofp %47 : vector<32x8xi32> to vector<32x8xf32>
    %49 = arith.mulf %48, %44 : vector<32x8xf32>
    %cst_16 = arith.constant dense<0.000000e+00> : vector<32xf32>
    %50 = vector.multi_reduction <add>, %49, %cst_16 [1] : vector<32x8xf32> to vector<32xf32>
    %51 = vector.shape_cast %50 : vector<32xf32> to vector<32x1xf32>
    %52 = arith.subf %51, %19 : vector<32x1xf32>
    %53 = arith.subf %52, %25 : vector<32x1xf32>
    %c8_i32_17 = arith.constant 8 : i32
    %54 = vector.broadcast %c8_i32_17 : i32 to vector<32x128xi32>
    %55 = arith.cmpi eq, %13, %54 : vector<32x128xi32>
    %56 = arith.sitofp %43 : vector<32x1xi32> to vector<32x1xf32>
    %57 = vector.shape_cast %56 : vector<32x1xf32> to vector<32x1xf32>
    %58 = vector.broadcast %57 : vector<32x1xf32> to vector<32x128xf32>
    %59 = arith.select %55, %58, %27 : vector<32x128xi1>, vector<32x128xf32>
    %c9_i32 = arith.constant 9 : i32
    %60 = vector.broadcast %c9_i32 : i32 to vector<32x128xi32>
    %61 = arith.cmpi eq, %13, %60 : vector<32x128xi32>
    %62 = vector.shape_cast %53 : vector<32x1xf32> to vector<32x1xf32>
    %63 = vector.broadcast %62 : vector<32x1xf32> to vector<32x128xf32>
    %64 = arith.select %61, %63, %59 : vector<32x128xi1>, vector<32x128xf32>
    %c10_i32 = arith.constant 10 : i32
    %65 = vector.broadcast %c10_i32 : i32 to vector<32x128xi32>
    %66 = arith.cmpi eq, %13, %65 : vector<32x128xi32>
    %67 = arith.select %66, %12, %64 : vector<32x128xi1>, vector<32x128xf32>
    %c0_18 = arith.constant 0 : index
    %c0_19 = arith.constant 0 : index
    %68 = vector.load %arg4[%c0_18, %c0_19] : memref<32x128xf32, #tpu.memory_space<vmem>>, vector<32x128xf32>
    tpu.vector_store %arg4[%c0_18, %c0_19], %67 {strides = array<i32>} : memref<32x128xf32, #tpu.memory_space<vmem>>, vector<32x128xf32>,
    return
  }
  func.func @transform_0(%arg0: i32) -> (i32, i32) {
    %c0_i32 = arith.constant 0 : i32
    %c0_i32_0 = arith.constant 0 : i32
    return %arg0, %c0_i32 : i32, i32
  }
  func.func @transform_1(%arg0: i32) -> (i32, i32) {
    %c0_i32 = arith.constant 0 : i32
    %c0_i32_0 = arith.constant 0 : i32
    return %arg0, %c0_i32 : i32, i32
  }
  func.func @transform_2(%arg0: i32) -> (i32, i32) {
    %c0_i32 = arith.constant 0 : i32
    %c0_i32_0 = arith.constant 0 : i32
    %c0_i32_1 = arith.constant 0 : i32
    return %c0_i32, %c0_i32_0 : i32, i32
  }
  func.func @transform_3(%arg0: i32) -> (i32, i32) {
    %c0_i32 = arith.constant 0 : i32
    %c0_i32_0 = arith.constant 0 : i32
    return %arg0, %c0_i32 : i32, i32
  }
}

</mosaic_0001>

<bundles_post_ra>
// kernel: policy_forward.1
= control target key start
LH: loop header
LB: loop body
LE: loop exit
PB: predicated region body
PF: predicated region fallthrough
CT: control target
= control target key end

     0   :  { %s865_s12 = smov 0   ;;  %s1082_s0 = inlined_call_operand.vmem [shape: f32[64,16], index: 0, kind: input, shape index: {}]   ;;  %s1083_s1 = inlined_call_operand.vmem [shape: f32[64,8], index: 1, kind: input, shape index: {}]   ;;  %s1084_s2 = inlined_call_operand.vmem [shape: f32[160,128], index: 2, kind: input, shape index: {}]   ;;  %s1085_s3 = inlined_call_operand.vmem [shape: f32[64,128], index: 3, kind: output, shape index: {}]  }
   0x1 LB: > { %s654_s13 = sadd.s32 4294967295, %s842_s12   ;;  %p658_p0 = scmp.ge.s32.totalorder %s842_s12, 1  ;;  %s842_s12 = sphi %s865_s12, %s13_s12  }
   0x2   : > { %p149_p1 = scmp.lt.s32.totalorder %s842_s12, 3 }
   0x4   : > { %p150_p2 = pnand %p658_p0, %p149_p1 }
   0x5   : > { %v200_v0 = vld [vmem:[%s1084_s2] sm:$0xff] (!%p150_p2)  ;;  %v201_v1 = vld [vmem:[%s1084_s2 + $0x8] sm:$0xff] (!%p150_p2)  ;;  %s659_s18 = sshll.u32 (!%p150_p2), %s654_s13, 2  ;;  %v203_v2 = vld [vmem:[%s1084_s2 + $0x18] sm:$0xff] (!%p150_p2)  ;;  %vm224_vm0 = vcmask (!%p150_p2), 130048   ;;  %v415_v44 = vlaneseq (!%p150_p2)  ;;  %vm478_vm2 = vcmask (!%p150_p2), 64512  }
   0x6   : > { %153 = sbr.rel (%p150_p2) target bundleno = 1070 (0x42e), region = 32  ;;  %v751_v3 = vpack.c.bf16 (!%p150_p2), %v201_v1, %v200_v0  ;;  %p179_p3 = scmp.lt.s32.totalorder (!%p150_p2), %s659_s18, 7  ;;  %v204_v4 = vld [vmem:[%s1084_s2 + $0x20] sm:$0xff] (!%p150_p2)  ;;  %v205_v5 = vld [vmem:[%s1084_s2 + $0x28] sm:$0xff] (!%p150_p2)  ;;  %v206_v6 = vld [vmem:[%s1084_s2 + $0x30] sm:$0xff] (!%p150_p2) }
   0x7   : > { %v755_v7 = vpack.c.bf16 (!%p150_p2), %v204_v4, %v203_v2  ;;  %v759_v8 = vpack.c.bf16 (!%p150_p2), %v206_v6, %v205_v5  ;;  %v207_v9 = vld [vmem:[%s1084_s2 + $0x38] sm:$0xff] (!%p150_p2)  ;;  %v208_v10 = vld [vmem:[%s1084_s2 + $0x40] sm:$0xff] (!%p150_p2)  ;;  %v209_v13 = vld [vmem:[%s1084_s2 + $0x48] sm:$0xff] (!%p150_p2)  ;;  %v940_v45 = vand.u32 (!%p150_p2), 127, %v415_v44 }
   0x8   : > { %752 = vmatprep.subr.bf16.mxu0 (!%p150_p2), %v751_v3  ;;  %v763_v11 = vpack.c.bf16 (!%p150_p2), %v208_v10, %v207_v9  ;;  %v210_v14 = vld [vmem:[%s1084_s2 + $0x50] sm:$0xff] (!%p150_p2)  ;;  %v211_v19 = vld [vmem:[%s1084_s2 + $0x58] sm:$0xff] (!%p150_p2)  ;;  %v212_v20 = vld [vmem:[%s1084_s2 + $0x60] sm:$0xff] (!%p150_p2) }
   0x9   : > { %754 = vmatpush3.bf16.msra.mxu0 (!%p150_p2), %v751_v3  ;;  %756 = vmatprep.subr.bf16.mxu1 (!%p150_p2), %v755_v7  ;;  %v767_v18 = vpack.c.bf16 (!%p150_p2), %v210_v14, %v209_v13  ;;  %v771_v21 = vpack.c.bf16 (!%p150_p2), %v212_v20, %v211_v19  ;;  %v213_v22 = vld [vmem:[%s1084_s2 + $0x68] sm:$0xff] (!%p150_p2)  ;;  %v214_v23 = vld [vmem:[%s1084_s2 + $0x70] sm:$0xff] (!%p150_p2)  ;;  %v215_v25 = vld [vmem:[%s1084_s2 + $0x78] sm:$0xff] (!%p150_p2)  ;;  %vm417_vm1 = vcmp.lt.s32.totalorder (!%p150_p2), %v940_v45, 8  ;;  %vm563_vm15 = vcmp.eq.s32.totalorder (!%p150_p2), %v940_v45, 8 }
   0xa   : > { %758 = vmatpush3.bf16.msra.mxu1 (!%p150_p2), %v755_v7  ;;  %v775_v24 = vpack.c.bf16 (!%p150_p2), %v214_v23, %v213_v22  ;;  %v216_v26 = vld [vmem:[%s1084_s2 + $0x80] sm:$0xff] (!%p150_p2)  ;;  %v217_v28 = vld [vmem:[%s1084_s2 + $0x88] sm:$0xff] (!%p150_p2)  ;;  %v218_v29 = vld [vmem:[%s1084_s2 + $0x90] sm:$0xff] (!%p150_p2) }
   0xb   : > { %760 = vmatprep.subr.bf16.mxu1 (!%p150_p2), %v759_v8  ;;  %v779_v27 = vpack.c.bf16 (!%p150_p2), %v216_v26, %v215_v25  ;;  %v783_v30 = vpack.c.bf16 (!%p150_p2), %v218_v29, %v217_v28  ;;  %v665_v31 = vld [vmem:[%s1084_s2 + $0x10] ss:$0 sm:$0xff] (!%p150_p2)  ;;  %v670_v46 = vld [vmem:[%s1084_s2 + $0x98] ss:$0 sm:$0xff] (!%p150_p2) }
   0xd   : > { %s1087_s18 = smov (!%p179_p3, %s659_s18), 7 }
   0xe   : > { %s897_s4 = sshll.u32 %s1087_s18, 3  ;;  %762 = vmatpush3.bf16.msra.mxu1 %v759_v8 }
   0xf   : > { %s182_s7 = scalar_lea.vmem %s1082_s0, %s897_s4  ;;  %764 = vmatprep.subr.bf16.mxu1 %v763_v11  ;;  %s188_s9 = scalar_lea.vmem %s1083_s1, %s897_s4 }
  0x10   : > { %v196_v12 = vld [vmem:[%s182_s7] sm:$0xff]  ;;  %v197_v15 = vld [vmem:[%s182_s7 + $0x8] sm:$0xff]  ;;  %v198_v16 = vld [vmem:[%s182_s7 + $0x10] sm:$0xff]  ;;  %s1036_s13 = scalar_lea.vmem %s1085_s3, %s897_s4 }
  0x11   : > { %707 = vmatprep.mubr.msk.f32.mxu0 %vm224_vm0, %v196_v12  ;;  %v199_v17 = vld [vmem:[%s182_s7 + $0x18] sm:$0xff]  ;;  %v466_v59 = vld [vmem:[%s188_s9] sm:$0xff]  ;;  %v468_v63 = vld [vmem:[%s188_s9 + $0x10] sm:$0xff] }
  0x12   : > { %708 = vmatmul.mubr.msk.f32.vlgmr.msra.gmra.mrb[0].mxu0 %vm224_vm0, %v197_v15  ;;  %766 = vmatpush3.bf16.msra.mxu1 %v763_v11  ;;  %804 = vrcp.f32 %v466_v59  ;;  %v467_v2 = vld [vmem:[%s188_s9 + $0x8] sm:$0xff]  ;;  %v469_v7 = vld [vmem:[%s188_s9 + $0x18] sm:$0xff] }
  0x13   : > { %710 = vmatprep.mubr.msk.f32.mxu0 %vm224_vm0, %v198_v16  ;;  %768 = vmatprep.subr.bf16.mxu1 %v767_v18 }
  0x16   : > { %711 = vmatmul.mubr.msk.f32.gmra.mrb[2].mxu0 %vm224_vm0, %v199_v17  ;;  %770 = vmatpush3.bf16.msra.mxu1 %v767_v18  ;;  %vm572_vm0 = vcmp.eq.s32.totalorder %v940_v45, 9 }
  0x17   : > { %772 = vmatprep.subr.bf16.mxu1 %v771_v21 }
  0x1a   : > { %774 = vmatpush3.bf16.msra.mxu1 %v771_v21 }
  0x1b   : > { %776 = vmatprep.subr.bf16.mxu1 %v775_v24 }
  0x1c   : > { %v805_v11 = vpop.eup %804 }
  0x1e   : > { %778 = vmatpush3.bf16.msra.mxu1 %v775_v24 }
  0x1f   : > { %780 = vmatprep.subr.bf16.mxu1 %v779_v27 }
  0x22   : > { %782 = vmatpush3.bf16.msra.mxu1 %v779_v27 }
  0x23   : > { %784 = vmatprep.subr.bf16.mxu1 %v783_v30 }
  0x26   : > { %786 = vmatpush3.bf16.msra.mxu1 %v783_v30 }
  0xe5   : > { %v709_v32 = vpop.f32.mrb[0].mxu0 }
  0xe6   : > { %v309_v33 = vadd.f32 %v709_v32, %v665_v31  ;;  %v303_v34 = vpop.f32.mrb[1].mxu0 }
  0xe7   : > { %v304_v35 = vadd.f32 %v665_v31, %v303_v34 }
  0xe8   : > { %v323_v38 = vmax.f32 %v309_v33, 0.0 }
  0xe9   : > { %v712_v36 = vpop.f32.mrb[2].mxu0  ;;  %v322_v37 = vmax.f32 %v304_v35, 0.0 }
  0xea   : > { %v319_v39 = vadd.f32 %v712_v36, %v665_v31  ;;  %v313_v40 = vpop.f32.mrb[3].mxu0 }
  0xeb   : > { %v314_v41 = vadd.f32 %v665_v31, %v313_v40  ;;  %745 = vmatprep.mubr.f32.mxu1 %v322_v37 }
  0xec   : > { %746 = vmatmul.mubr.f32.vlgmr.msra.gmra.mrb[0].mxu1 %v323_v38  ;;  %v325_v43 = vmax.f32 %v319_v39, 0.0 }
  0xed   : > { %v324_v42 = vmax.f32 %v314_v41, 0.0 }
  0xef   : > { %748 = vmatprep.mubr.f32.mxu1 %v324_v42 }
  0xf0   : > { %749 = vmatmul.mubr.f32.gmra.mrb[2].mxu1 %v325_v43 }
 0x1bf   : > { %v747_v47 = vpop.f32.mrb[0].mxu1 }
 0x1c0   : > { %v396_v48 = vpop.f32.mrb[1].mxu1  ;;  %v948_v50 = vadd.f32 %v747_v47, %v670_v46 }
 0x1c1   : > { %v946_v49 = vadd.f32 %v670_v46, %v396_v48 }
 0x1c2   : > { %v419_v57 = vsel %vm417_vm1, %v948_v50, -1e+30 }
 0x1c3   : > { %v750_v51 = vpop.f32.mrb[2].mxu1  ;;  %v418_v52 = vsel %vm417_vm1, %v946_v49, -1e+30 }
 0x1c4   : > { %v406_v53 = vpop.f32.mrb[3].mxu1  ;;  %422 = vmax.xlane.f32.xlu0 %v418_v52  ;;  %v953_v55 = vadd.f32 %v750_v51, %v670_v46 }
 0x1c5   : > { %v951_v54 = vadd.f32 %v670_v46, %v406_v53 }
 0x1c6   : > { %v421_v58 = vsel %vm417_vm1, %v953_v55, -1e+30 }
 0x1c7   : > { %v420_v56 = vsel %vm417_vm1, %v951_v54, -1e+30  ;;  %vm577_vm1 = vcmp.eq.s32.totalorder %v940_v45, 10 }
 0x1c8   : > { %426 = vmax.xlane.f32.xlu1 %v420_v56  ;;  %424 = vmax.xlane.f32.xlu0 %v419_v57 }
 0x1cc   : > { %428 = vmax.xlane.f32.xlu1 %v421_v58 }
 0x251   : > { %v962_v60 = vpop.xlane.xlu0 %422 }
 0x252   : > { %v430_v61 = vsub.f32 %v418_v52, %v962_v60 }
 0x254   : > { %v434_v62 = vmul.f32 1.442695, %v430_v61 }
 0x255   : > { %v965_v0 = vpop.xlane.xlu1 %426  ;;  %v967_v1 = vpop.xlane.xlu0 %424 }
 0x256   : > { %806 = vpow2.f32 %v434_v62  ;;  %v432_v3 = vsub.f32 %v420_v56, %v965_v0  ;;  %v431_v4 = vsub.f32 %v419_v57, %v967_v1 }
 0x257   : > { %808 = vrcp.f32 %v468_v63 }
 0x258   : > { %v438_v5 = vmul.f32 1.442695, %v432_v3  ;;  %v436_v6 = vmul.f32 1.442695, %v431_v4  ;;  %810 = vrcp.f32 %v467_v2 }
 0x259   : > { %v971_v8 = vpop.xlane.xlu1 %428 }
 0x25a   : > { %812 = vpow2.f32 %v438_v5  ;;  %v433_v9 = vsub.f32 %v421_v58, %v971_v8  ;;  %v844_v58 = vmov 0.0  }
 0x25b   : > { %814 = vpow2.f32 %v436_v6 }
 0x25c   : > { %816 = vrcp.f32 %v469_v7  ;;  %v440_v10 = vmul.f32 1.442695, %v433_v9 }
 0x25e   : > { %818 = vpow2.f32 %v440_v10 }
 0x260   : > { %v974_v12 = vpop.eup %806 }
 0x261   : > { %v471_v13 = vmul.f32 %v974_v12, %v805_v11  ;;  %v809_v14 = vpop.eup %808 }
 0x262   : > { %v811_v15 = vpop.eup %810 }
 0x263   : > { %v479_v16 = vsel %vm478_vm2, %v471_v13, -inf }
 0x264   : > { %v978_v17 = vpop.eup %812  ;;  %480 = vmax.xlane.f32.xlu0 %v479_v16 }
 0x265   : > { %v980_v18 = vpop.eup %814  ;;  %v475_v19 = vmul.f32 %v978_v17, %v809_v14 }
 0x266   : > { %v817_v20 = vpop.eup %816  ;;  %v473_v21 = vmul.f32 %v980_v18, %v811_v15 }
 0x267   : > { %v485_v22 = vsel %vm478_vm2, %v475_v19, -inf }
 0x268   : > { %v985_v23 = vpop.eup %818  ;;  %486 = vmax.xlane.f32.xlu0 %v485_v22  ;;  %v482_v24 = vsel %vm478_vm2, %v473_v21, -inf }
 0x269   : > { %483 = vmax.xlane.f32.xlu1 %v482_v24  ;;  %v477_v25 = vmul.f32 %v985_v23, %v817_v20 }
 0x26b   : > { %v488_v26 = vsel %vm478_vm2, %v477_v25, -inf }
 0x26d   : > { %489 = vmax.xlane.f32.xlu1 %v488_v26 }
 0x2f1   : > { %v481_v27 = vpop.xlane.xlu0 %480 }
 0x2f2   : > { %vm491_vm3 = vcmp.ge.f32.partialorder %v471_v13, %v481_v27 }
 0x2f3   : > { %v495_v28 = vsel %vm491_vm3, %v940_v45, 8 }
 0x2f4   : > { %v499_v29 = vcvt.s32.f32 %v495_v28 }
 0x2f5   : > { %v487_v30 = vpop.xlane.xlu0 %486 }
 0x2f6   : > { %v484_v31 = vpop.xlane.xlu1 %483  ;;  %vm493_vm4 = vcmp.ge.f32.partialorder %v475_v19, %v487_v30  ;;  %v503_v32 = vsel %vm478_vm2, %v499_v29, inf }
 0x2f7   : > { %vm492_vm5 = vcmp.ge.f32.partialorder %v473_v21, %v484_v31  ;;  %v497_v33 = vsel %vm493_vm4, %v940_v45, 8  ;;  %504 = vmin.xlane.f32.xlu0 %v503_v32 }
 0x2f8   : > { %v496_v34 = vsel %vm492_vm5, %v940_v45, 8  ;;  %v501_v35 = vcvt.s32.f32 %v497_v33 }
 0x2f9   : > { %v500_v36 = vcvt.s32.f32 %v496_v34 }
 0x2fa   : > { %v490_v37 = vpop.xlane.xlu1 %489  ;;  %v509_v38 = vsel %vm478_vm2, %v501_v35, inf }
 0x2fb   : > { %vm494_vm6 = vcmp.ge.f32.partialorder %v477_v25, %v490_v37  ;;  %v506_v39 = vsel %vm478_vm2, %v500_v36, inf  ;;  %510 = vmin.xlane.f32.xlu0 %v509_v38 }
 0x2fc   : > { %v498_v40 = vsel %vm494_vm6, %v940_v45, 8  ;;  %507 = vmin.xlane.f32.xlu1 %v506_v39 }
 0x2fd   : > { %v502_v41 = vcvt.s32.f32 %v498_v40 }
 0x2ff   : > { %v512_v42 = vsel %vm478_vm2, %v502_v41, inf  ;;  %442 = vadd.xlane.f32.xlu0 %v974_v12 }
 0x300   : > { %513 = vmin.xlane.f32.xlu1 %v512_v42 }
 0x303   : > { %446 = vadd.xlane.f32.xlu0 %v978_v17 }
 0x304   : > { %444 = vadd.xlane.f32.xlu1 %v980_v18 }
 0x308   : > { %448 = vadd.xlane.f32.xlu1 %v985_v23 }
 0x384   : > { %v505_v43 = vpop.xlane.xlu0 %504 }
 0x385   : > { %v787_v44 = vtrunc.f32 %v505_v43 }
 0x387   : > { %v788_v46 = vcvt.f32.s32 %v787_v44 }
 0x388   : > { %v511_v47 = vpop.xlane.xlu0 %510 }
 0x389   : > { %vm519_vm7 = vcmp.lt.s32.totalorder %v788_v46, 7  ;;  %v508_v48 = vpop.xlane.xlu1 %507  ;;  %v791_v51 = vtrunc.f32 %v511_v47 }
 0x38a   : > { %v1002_v52 = vsel %vm519_vm7, %v788_v46, 7  ;;  %v789_v53 = vtrunc.f32 %v508_v48 }
 0x38b   : > { %vm527_vm8 = vcmp.eq.s32.totalorder %v940_v45, %v1002_v52  ;;  %v792_v56 = vcvt.f32.s32 %v791_v51  ;;  %v564_v34 = vcvt.s32.f32 %v1002_v52 }
 0x38c   : > { %v790_v57 = vcvt.f32.s32 %v789_v53  ;;  %v671_v59 = vsel %vm527_vm8, 1.0, %v844_v58  ;;  %v443_v20 = vpop.xlane.xlu0 %442 }
 0x38d   : > { %vm523_vm9 = vcmp.lt.s32.totalorder %v792_v56, 7  ;;  %v514_v61 = vpop.xlane.xlu1 %513  ;;  %v539_v62 = vmul.f32 %v671_v59, %v946_v49  ;;  %820 = vrcp.f32 %v443_v20 }
 0x38e   : > { %vm521_vm10 = vcmp.lt.s32.totalorder %v790_v57, 7  ;;  %v1007_v63 = vsel %vm523_vm9, %v792_v56, 7  ;;  %v793_v2 = vtrunc.f32 %v514_v61  ;;  %822 = vlog2.f32 %v443_v20 }
 0x38f   : > { %v1009_v3 = vsel %vm521_vm10, %v790_v57, 7  ;;  %vm529_vm11 = vcmp.eq.s32.totalorder %v940_v45, %v1007_v63  ;;  %v543_v4 = vsel %vm478_vm2, %v539_v62, 0.0  ;;  %v566_v44 = vcvt.s32.f32 %v1007_v63 }
 0x390   : > { %vm528_vm12 = vcmp.eq.s32.totalorder %v940_v45, %v1009_v3  ;;  %v794_v5 = vcvt.f32.s32 %v793_v2  ;;  %544 = vadd.xlane.f32.xlu0 %v543_v4  ;;  %v673_v6 = vsel %vm529_vm11, 1.0, %v844_v58  ;;  %v447_v22 = vpop.xlane.xlu0 %446 }
 0x391   : > { %v672_v7 = vsel %vm528_vm12, 1.0, %v844_v58  ;;  %v541_v9 = vmul.f32 %v673_v6, %v951_v54  ;;  %v445_v21 = vpop.xlane.xlu1 %444  ;;  %824 = vlog2.f32 %v447_v22 }
 0x392   : > { %vm525_vm13 = vcmp.lt.s32.totalorder %v794_v5, 7  ;;  %v540_v10 = vmul.f32 %v672_v7, %v948_v50  ;;  %826 = vrcp.f32 %v447_v22 }
 0x393   : > { %v1018_v11 = vsel %vm525_vm13, %v794_v5, 7  ;;  %v549_v13 = vsel %vm478_vm2, %v541_v9, 0.0  ;;  %828 = vrcp.f32 %v445_v21 }
 0x394   : > { %vm530_vm14 = vcmp.eq.s32.totalorder %v940_v45, %v1018_v11  ;;  %v546_v14 = vsel %vm478_vm2, %v540_v10, 0.0  ;;  %550 = vadd.xlane.f32.xlu0 %v549_v13  ;;  %830 = vlog2.f32 %v445_v21 }
 0x395   : > { %547 = vadd.xlane.f32.xlu1 %v546_v14  ;;  %v674_v15 = vsel %vm530_vm14, 1.0, %v844_v58  ;;  %v449_v24 = vpop.xlane.xlu1 %448 }
 0x396   : > { %v542_v16 = vmul.f32 %v674_v15, %v953_v55  ;;  %832 = vrcp.f32 %v449_v24 }
 0x397   : > { %v821_v25 = vpop.eup %820  ;;  %834 = vlog2.f32 %v449_v24 }
 0x398   : > { %v552_v19 = vsel %vm478_vm2, %v542_v16, 0.0  ;;  %v823_v26 = vpop.eup %822  ;;  %v459_v28 = vmul.f32 %v821_v25, %v974_v12 }
 0x399   : > { %553 = vadd.xlane.f32.xlu1 %v552_v19  ;;  %v451_v31 = vmul.f32 0.6931472, %v823_v26 }
 0x39b   : > { %v825_v27 = vpop.eup %824 }
 0x39c   : > { %v827_v30 = vpop.eup %826  ;;  %v455_v41 = vmul.f32 0.6931472, %v825_v27 }
 0x39d   : > { %v829_v33 = vpop.eup %828  ;;  %v463_v12 = vmul.f32 %v827_v30, %v978_v17 }
 0x39e   : > { %v831_v35 = vpop.eup %830  ;;  %v461_v38 = vmul.f32 %v829_v33, %v980_v18  ;;  %v565_v18 = vcvt.s32.f32 %v1009_v3 }
 0x39f   : > { %v453_v46 = vmul.f32 0.6931472, %v831_v35 }
 0x3a0   : > { %v833_v43 = vpop.eup %832 }
 0x3a1   : > { %v835_v48 = vpop.eup %834  ;;  %v465_v53 = vmul.f32 %v833_v43, %v985_v23  ;;  %v567_v23 = vcvt.s32.f32 %v1018_v11 }
 0x3a2   : > { %v457_v59 = vmul.f32 0.6931472, %v835_v48 }
 0x3a3   : > { %v571_v2 = vsel %vm563_vm15, %v567_v23, %v465_v53 }
 0x41d   : > { %v545_v29 = vpop.xlane.xlu0 %544 }
 0x41e   : > { %v555_v32 = vsub.f32 %v545_v29, %v962_v60  ;;  %v568_v60 = vsel %vm563_vm15, %v564_v34, %v459_v28 }
 0x420   : > { %v559_v36 = vsub.f32 %v555_v32, %v451_v31 }
 0x421   : > { %v551_v37 = vpop.xlane.xlu0 %550 }
 0x422   : > { %v573_v39 = vsel %vm572_vm0, %v559_v36, %v568_v60  ;;  %v548_v40 = vpop.xlane.xlu1 %547  ;;  %v557_v42 = vsub.f32 %v551_v37, %v965_v0  ;;  %v570_v0 = vsel %vm563_vm15, %v566_v44, %v463_v12 }
 0x423   : > { %v578_v17 = vsel %vm577_vm1, %v946_v49, %v573_v39  ;;  %v556_v47 = vsub.f32 %v548_v40, %v967_v1  ;;  %v569_v49 = vsel %vm563_vm15, %v565_v18, %v461_v38 }
 0x424   : > { %582 = vst [vmem:[%s1036_s13] sm:$0xff] %v578_v17  ;;  %v561_v51 = vsub.f32 %v557_v42, %v455_v41 }
 0x425   : > { %v560_v52 = vsub.f32 %v556_v47, %v453_v46 }
 0x426   : > { %v575_v1 = vsel %vm572_vm0, %v561_v51, %v570_v0  ;;  %v554_v56 = vpop.xlane.xlu1 %553 }
 0x427   : > { %v574_v57 = vsel %vm572_vm0, %v560_v52, %v569_v49  ;;  %v580_v58 = vsel %vm577_vm1, %v951_v54, %v575_v1  ;;  %v558_v61 = vsub.f32 %v554_v56, %v971_v8 }
 0x428   : > { %v579_v62 = vsel %vm577_vm1, %v948_v50, %v574_v57  ;;  %584 = vst [vmem:[%s1036_s13 + $0x10] sm:$0xff] %v580_v58 }
 0x429   : > { %583 = vst [vmem:[%s1036_s13 + $0x8] sm:$0xff] %v579_v62  ;;  %v562_v63 = vsub.f32 %v558_v61, %v457_v59 }
 0x42b   : > { %v576_v3 = vsel %vm572_vm0, %v562_v63, %v571_v2 }
 0x42c   : > { %v581_v54 = vsel %vm577_vm1, %v953_v55, %v576_v3 }
 0x42d   : > { %585 = vst [vmem:[%s1036_s13 + $0x18] sm:$0xff] %v581_v54 }
 0x42e PF: > { %s13_s12 = sadd.s32 1, %s842_s12  }
 0x42f   : > { %p10_p4 = scmp.ge.s32.totalorder %s13_s12, 4  }
 0x431   :  { %12 = sbr.rel (!%p10_p4) target bundleno = 1 (0x1), region = 65 }

</bundles_post_ra>
